<compile_context>
chip_gen: v6e
topology: v6e:2x2x1
jax: 0.10.0
libtpu: 0.0.40
codegen_flags: <defaults>
</compile_context>

<pallas_src>
import functools

import jax
import jax.numpy as jnp
from jax import lax
from jax.experimental import pallas as pl
from jax.experimental.pallas import tpu as pltpu


# ---------------------------------------------------------------------------
# Kernels
# ---------------------------------------------------------------------------

def _instance_norm_kernel(x_ref, scale_ref, shift_ref, o_ref, *, eps, n, mask_lanes):
    # x_ref:     (tm, block_n) rows = (b, c) pairs, cols = flattened spatial (maybe lane-padded)
    # scale_ref: (tm, 1)       per-row scale (channel scale replicated over batch), f32
    # shift_ref: (tm, 1)       per-row shift, f32
    x = x_ref[...].astype(jnp.float32)
    if mask_lanes:
        # block_n was rounded up to a multiple of 128; zero the padded lanes so they
        # do not contaminate the reductions (still divide by the true n).
        col = lax.broadcasted_iota(jnp.int32, x.shape, 1)
        x = jnp.where(col < n, x, 0.0)

    inv_n = 1.0 / n
    s1 = jnp.sum(x, axis=-1, keepdims=True)
    s2 = jnp.sum(x * x, axis=-1, keepdims=True)
    mean = s1 * inv_n
    # One-pass (biased) variance; clamp protects near-constant rows from tiny negatives.
    var = jnp.maximum(s2 * inv_n - mean * mean, 0.0)

    a = lax.rsqrt(var + eps) * scale_ref[...]        # (tm, 1)
    b = shift_ref[...] - mean * a                    # (tm, 1)
    # Rows beyond the true row count (ragged last block) produce garbage here but are
    # clipped by Pallas on the write-back, so they are never observed.
    o_ref[...] = (x * a + b).astype(o_ref.dtype)


def _stats_kernel(x_ref, scale_ref, shift_ref, a_ref, b_ref, *, eps, n, tn):
    # Large-spatial fallback, pass 1: accumulate sum / sumsq across spatial blocks
    # (grid axis 1, "arbitrary"), finalize into a = rsqrt(var+eps)*scale and
    # b = shift - mean*a on the last block.  a_ref/b_ref double as the accumulators.
    k = pl.program_id(1)

    @pl.when(k == 0)
    def _():
        a_ref[...] = jnp.zeros_like(a_ref)
        b_ref[...] = jnp.zeros_like(b_ref)

    x = x_ref[...].astype(jnp.float32)
    col = k * tn + lax.broadcasted_iota(jnp.int32, x.shape, 1)
    x = jnp.where(col < n, x, 0.0)                   # mask ragged/padded lanes
    a_ref[...] += jnp.sum(x, axis=-1, keepdims=True)
    b_ref[...] += jnp.sum(x * x, axis=-1, keepdims=True)

    @pl.when(k == pl.num_programs(1) - 1)
    def _():
        inv_n = 1.0 / n
        mean = a_ref[...] * inv_n
        var = jnp.maximum(b_ref[...] * inv_n - mean * mean, 0.0)
        a = lax.rsqrt(var + eps) * scale_ref[...]
        a_ref[...] = a
        b_ref[...] = shift_ref[...] - mean * a


def _apply_kernel(x_ref, a_ref, b_ref, o_ref):
    # Large-spatial fallback, pass 2: out = x * a + b.
    x = x_ref[...].astype(jnp.float32)
    o_ref[...] = (x * a_ref[...] + b_ref[...]).astype(o_ref.dtype)


# ---------------------------------------------------------------------------
# Sizing helpers
# ---------------------------------------------------------------------------

def _round_up(a, m):
    return ((a + m - 1) // m) * m


def _vmem_budget_bytes():
    """~80% of this generation's VMEM capacity (floor 32 MiB, cap 110 MiB)."""
    cap = 64 << 20  # conservative default (v7x per-TensorCore VMEM)
    try:
        info = pltpu.get_tpu_info()
        cap = int(getattr(info, "vmem_capacity_bytes", cap)) or cap
    except Exception:
        pass
    return int(max(32 << 20, min(cap * 4 // 5, 110 << 20)))


def _per_row_bytes(block_n, itemsize):
    # Per tile-row VMEM residents: 2x input buffers + 2x output buffers (double
    # buffering, native dtype) + ~2 f32 full-width in-kernel temporaries + the
    # lane-padded (tm,1) f32 scale/shift buffers (2 params x 2 buffers x 512 B).
    return block_n * (4 * itemsize + 8) + 4 * 512


# ---------------------------------------------------------------------------
# Wrapper
# ---------------------------------------------------------------------------

def instance_normalization(x, scale, shift, eps=1e-9):
    """x: [B, C, H, W]; scale, shift: [C]. Returns same shape/dtype as x."""
    B, C, H, W = x.shape
    n = H * W
    rows = B * C
    itemsize = jnp.dtype(x.dtype).itemsize
    sub = max(8, 32 // itemsize)          # sublane packing multiple (f32:8, bf16:16, int8:32)

    x2d = x.reshape(rows, n)              # native dtype; kernel upcasts to f32
    # Per-row params: row r = b*C + c -> channel c = r % C  (tiny [rows,1] arrays).
    scale_rows = jnp.tile(scale.astype(jnp.float32), B).reshape(rows, 1)
    shift_rows = jnp.tile(shift.astype(jnp.float32), B).reshape(rows, 1)

    budget = _vmem_budget_bytes()

    # Lane-dense block width: round the spatial dim up to 128 and mask in-kernel.
    block_n = n if n % 128 == 0 else _round_up(n, 128)
    mask_lanes = block_n != n
    per_row = _per_row_bytes(block_n, itemsize)

    if sub * per_row <= budget:
        # ------------------------- main path: one pass, whole rows ----------------
        tm = max(sub, (budget // per_row) // sub * sub)
        if rows >= 2 * sub:
            # Guarantee >= 2 grid steps so both v7x TensorCores get work.
            tm = min(tm, _round_up(-(-rows // 2), sub))
        tm = min(tm, _round_up(rows, sub))
        grid = (pl.cdiv(rows, tm),)

        out2d = pl.pallas_call(
            functools.partial(_instance_norm_kernel, eps=float(eps), n=n,
                              mask_lanes=mask_lanes),
            out_shape=jax.ShapeDtypeStruct((rows, n), x.dtype),
            grid_spec=pltpu.PrefetchScalarGridSpec(
                num_scalar_prefetch=0,
                grid=grid,
                in_specs=[
                    pl.BlockSpec((tm, block_n), lambda i: (i, 0)),
                    pl.BlockSpec((tm, 1), lambda i: (i, 0)),
                    pl.BlockSpec((tm, 1), lambda i: (i, 0)),
                ],
                out_specs=pl.BlockSpec((tm, block_n), lambda i: (i, 0)),
            ),
            compiler_params=pltpu.CompilerParams(
                dimension_semantics=("parallel",),
                vmem_limit_bytes=budget,
            ),
        )(x2d, scale_rows, shift_rows)
        return out2d.reshape(B, C, H, W)

    # ------------------- fallback: huge H*W, tile the spatial axis ----------------
    tm_f = sub
    per_elem = 4 * itemsize + 8
    tn = max(128, (budget // (tm_f * per_elem)) // 128 * 128)
    nk = pl.cdiv(n, tn)
    grid_rows = pl.cdiv(rows, tm_f)

    a_rows, b_rows = pl.pallas_call(
        functools.partial(_stats_kernel, eps=float(eps), n=n, tn=tn),
        out_shape=(jax.ShapeDtypeStruct((rows, 1), jnp.float32),
                   jax.ShapeDtypeStruct((rows, 1), jnp.float32)),
        grid_spec=pltpu.PrefetchScalarGridSpec(
            num_scalar_prefetch=0,
            grid=(grid_rows, nk),
            in_specs=[
                pl.BlockSpec((tm_f, tn), lambda i, k: (i, k)),
                pl.BlockSpec((tm_f, 1), lambda i, k: (i, 0)),
                pl.BlockSpec((tm_f, 1), lambda i, k: (i, 0)),
            ],
            out_specs=(pl.BlockSpec((tm_f, 1), lambda i, k: (i, 0)),
                       pl.BlockSpec((tm_f, 1), lambda i, k: (i, 0))),
        ),
        compiler_params=pltpu.CompilerParams(
            dimension_semantics=("parallel", "arbitrary"),
            vmem_limit_bytes=budget,
        ),
    )(x2d, scale_rows, shift_rows)

    out2d = pl.pallas_call(
        _apply_kernel,
        out_shape=jax.ShapeDtypeStruct((rows, n), x.dtype),
        grid_spec=pltpu.PrefetchScalarGridSpec(
            num_scalar_prefetch=0,
            grid=(grid_rows, nk),
            in_specs=[
                pl.BlockSpec((tm_f, tn), lambda i, k: (i, k)),
                pl.BlockSpec((tm_f, 1), lambda i, k: (i, 0)),
                pl.BlockSpec((tm_f, 1), lambda i, k: (i, 0)),
            ],
            out_specs=pl.BlockSpec((tm_f, tn), lambda i, k: (i, k)),
        ),
        compiler_params=pltpu.CompilerParams(
            dimension_semantics=("parallel", "parallel"),
            vmem_limit_bytes=budget,
        ),
    )(x2d, a_rows, b_rows)
    return out2d.reshape(B, C, H, W)


def instance_normalization_ref(x, scale, shift, eps=1e-9):
    """Pure-JAX reference mirroring the PyTorch forward."""
    B, C, H, W = x.shape
    n = H * W
    t = x.reshape(B, C, n)
    mean = jnp.mean(t, axis=2)[:, :, None, None]
    # torch.var is unbiased; the forward multiplies by (n-1)/n -> biased variance.
    var_unbiased = jnp.var(t, axis=2, ddof=1)[:, :, None, None]
    var = var_unbiased * ((n - 1) / float(n))
    out = (x - mean) / jnp.sqrt(var + eps)
    return out * scale[None, :, None, None] + shift[None, :, None, None]


if __name__ == "__main__":
    key = jax.random.PRNGKey(0)
    kx, ks = jax.random.split(key)

    B, C, H, W = 2, 4, 16, 16
    x = jax.random.normal(kx, (B, C, H, W), dtype=jnp.float32)

    # Deterministic parameter init matching the module's __init__:
    # scale ~ uniform_(0, 1), shift = zeros.
    scale = jax.random.uniform(ks, (C,), dtype=jnp.float32)
    shift = jnp.zeros((C,), dtype=jnp.float32)

    out = instance_normalization(x, scale, shift, eps=1e-9)
    out = jax.block_until_ready(out)

    ref = instance_normalization_ref(x, scale, shift, eps=1e-9)
    assert out.shape == (B, C, H, W)
    assert out.dtype == x.dtype
    assert jnp.allclose(out, ref, atol=1e-5, rtol=1e-5), "mismatch vs reference"

    print("KERNEL_OK")
</pallas_src>

<mosaic_0001>
module attributes {stable_mosaic.version = 11 : i64} {
  func.func @_instance_norm_kernel(%arg0: i32, %arg1: memref<8x256xf32, #tpu.memory_space<vmem>>, %arg2: memref<8x1xf32, #tpu.memory_space<vmem>>, %arg3: memref<8x1xf32, #tpu.memory_space<vmem>>, %arg4: memref<8x256xf32, #tpu.memory_space<vmem>>) attributes {dimension_semantics = [#tpu.dimension_semantics<parallel>], iteration_bounds = array<i64: 1>, scalar_prefetch = 0 : i64, scratch_operands = 0 : i64, tpu.core_type = #tpu.core_type<tc>, window_params = [{transform_indices = @transform_0, window_bounds = array<i64: 8, 256>}, {transform_indices = @transform_1, window_bounds = array<i64: 8, 1>}, {transform_indices = @transform_2, window_bounds = array<i64: 8, 1>}, {transform_indices = @transform_3, window_bounds = array<i64: 8, 256>}]} {
    %c0 = arith.constant 0 : index
    %c0_0 = arith.constant 0 : index
    %0 = vector.load %arg1[%c0, %c0_0] : memref<8x256xf32, #tpu.memory_space<vmem>>, vector<8x256xf32>
    %cst = arith.constant dense<0.000000e+00> : vector<8xf32>
    %1 = vector.multi_reduction <add>, %0, %cst [1] : vector<8x256xf32> to vector<8xf32>
    %2 = vector.shape_cast %1 : vector<8xf32> to vector<8x1xf32>
    %3 = arith.mulf %0, %0 : vector<8x256xf32>
    %cst_1 = arith.constant dense<0.000000e+00> : vector<8xf32>
    %4 = vector.multi_reduction <add>, %3, %cst_1 [1] : vector<8x256xf32> to vector<8xf32>
    %5 = vector.shape_cast %4 : vector<8xf32> to vector<8x1xf32>
    %cst_2 = arith.constant 3.906250e-03 : f32
    %6 = vector.broadcast %cst_2 : f32 to vector<8x1xf32>
    %7 = arith.mulf %2, %6 : vector<8x1xf32>
    %cst_3 = arith.constant 3.906250e-03 : f32
    %8 = vector.broadcast %cst_3 : f32 to vector<8x1xf32>
    %9 = arith.mulf %5, %8 : vector<8x1xf32>
    %10 = arith.mulf %7, %7 : vector<8x1xf32>
    %11 = arith.subf %9, %10 : vector<8x1xf32>
    %cst_4 = arith.constant 0.000000e+00 : f32
    %12 = vector.broadcast %cst_4 : f32 to vector<8x1xf32>
    %13 = arith.maximumf %11, %12 : vector<8x1xf32>
    %cst_5 = arith.constant 9.99999971E-10 : f32
    %14 = vector.broadcast %cst_5 : f32 to vector<8x1xf32>
    %15 = arith.addf %13, %14 : vector<8x1xf32>
    %16 = math.rsqrt %15 : vector<8x1xf32>
    %c0_6 = arith.constant 0 : index
    %c0_7 = arith.constant 0 : index
    %17 = vector.load %arg2[%c0_6, %c0_7] : memref<8x1xf32, #tpu.memory_space<vmem>>, vector<8x1xf32>
    %18 = arith.mulf %16, %17 : vector<8x1xf32>
    %c0_8 = arith.constant 0 : index
    %c0_9 = arith.constant 0 : index
    %19 = vector.load %arg3[%c0_8, %c0_9] : memref<8x1xf32, #tpu.memory_space<vmem>>, vector<8x1xf32>
    %20 = arith.mulf %7, %18 : vector<8x1xf32>
    %21 = arith.subf %19, %20 : vector<8x1xf32>
    %22 = vector.broadcast %18 : vector<8x1xf32> to vector<8x256xf32>
    %23 = arith.mulf %0, %22 : vector<8x256xf32>
    %24 = vector.broadcast %21 : vector<8x1xf32> to vector<8x256xf32>
    %25 = arith.addf %23, %24 : vector<8x256xf32>
    %c0_10 = arith.constant 0 : index
    %c0_11 = arith.constant 0 : index
    %26 = vector.load %arg4[%c0_10, %c0_11] : memref<8x256xf32, #tpu.memory_space<vmem>>, vector<8x256xf32>
    tpu.vector_store %arg4[%c0_10, %c0_11], %25 {strides = array<i32>} : memref<8x256xf32, #tpu.memory_space<vmem>>, vector<8x256xf32>,
    return
  }
  func.func @transform_0(%arg0: i32) -> (i32, i32) {
    %c0_i32 = arith.constant 0 : i32
    %c0_i32_0 = arith.constant 0 : i32
    return %arg0, %c0_i32 : i32, i32
  }
  func.func @transform_1(%arg0: i32) -> (i32, i32) {
    %c0_i32 = arith.constant 0 : i32
    %c0_i32_0 = arith.constant 0 : i32
    return %arg0, %c0_i32 : i32, i32
  }
  func.func @transform_2(%arg0: i32) -> (i32, i32) {
    %c0_i32 = arith.constant 0 : i32
    %c0_i32_0 = arith.constant 0 : i32
    return %arg0, %c0_i32 : i32, i32
  }
  func.func @transform_3(%arg0: i32) -> (i32, i32) {
    %c0_i32 = arith.constant 0 : i32
    %c0_i32_0 = arith.constant 0 : i32
    return %arg0, %c0_i32 : i32, i32
  }
}

</mosaic_0001>

<bundles_post_ra>
// kernel: tpu_custom_call.1
= control target key start
LH: loop header
LB: loop body
LE: loop exit
PB: predicated region body
PF: predicated region fallthrough
CT: control target
= control target key end

     0   :  { %s132_s0 = inlined_call_operand.vmem [shape: f32[8,256], index: 0, kind: input, shape index: {}]   ;;  %s133_s1 = inlined_call_operand.vmem [shape: f32[8,1], index: 1, kind: input, shape index: {}]   ;;  %s134_s2 = inlined_call_operand.vmem [shape: f32[8,1], index: 2, kind: input, shape index: {}]   ;;  %s135_s3 = inlined_call_operand.hbm [shape: f32[8,256], index: 3, kind: output, shape index: {}]  }
   0x1   :  { %v15_v0 = vld [vmem:[%s132_s0] sm:$0xff]  ;;  %v16_v1 = vld [vmem:[%s132_s0 + $0x8] sm:$0xff] }
   0x2   :  { %8 = vsyncpa [#allocation3], 0  ;;  %v17_v2 = vadd.f32 %v16_v1, %v15_v0  ;;  %v20_v3 = vmul.f32 %v15_v0, %v15_v0  ;;  %v21_v4 = vmul.f32 %v16_v1, %v16_v1  ;;  %v95_v6 = vmov 0   ;;  %v32_v15 = vld [vmem:[%s133_s1] sm:$0xff]  ;;  %s96_s19 = smov [#allocation2]  }
   0x3   :  { %69 = vset.pattern.permute.xlu1 %v95_v6  ;;  %70 = vset.pattern.permute.xlu0 %v95_v6  ;;  %v34_v18 = vld [vmem:[%s134_s2] sm:$0xff]  ;;  %s59_s20 = sshll.u32 %s96_s19, 4  ;;  %s60_s20 = int_to_ptr.vmem [resolvable:$true] %s59_s20 }
   0x4   :  { %18 = vadd.xlane.f32.xlu0 %v17_v2  ;;  %v22_v5 = vadd.f32 %v21_v4, %v20_v3  ;;  %s73_s1 = scalar_lea.vmem %s60_s20, 256  ;;  %p78_p1 = scmp.lt.s32.totalorder %s60_s20, %s60_s20 }
   0x5   :  { %p74_p0 = scmp.ne.s32.totalorder %s60_s20, %s73_s1  ;;  %p79_p2 = scmp.lt.s32.totalorder %s73_s1, %s73_s1 }
   0x7   :  { %p80_p3 = por %p79_p2, %p78_p1 }
   0x8   :  { %23 = vadd.xlane.f32.xlu0 %v22_v5 }
   0x9   :  { %p81_p4 = pnand %p80_p3, %p74_p0 }
  0x8d   :  { %v19_v7 = vpop.xlane.xlu0 %18 }
  0x8e   :  { %v25_v8 = vmul.f32 0.00390625, %v19_v7 }
  0x90   :  { %v27_v10 = vmul.f32 %v25_v8, %v25_v8 }
  0x91   :  { %v24_v9 = vpop.xlane.xlu0 %23 }
  0x92   :  { %v26_v11 = vmul.f32 0.00390625, %v24_v9 }
  0x94   :  { %v28_v12 = vsub.f32 %v26_v11, %v27_v10 }
  0x96   :  { %v29_v13 = vmax.f32 %v28_v12, 0.0 }
  0x98   :  { %v30_v14 = vadd.f32 1e-09, %v29_v13 }
  0x9a   :  { %71 = vrsqrt.f32 %v30_v14 }
  0xa7   :  { %v72_v16 = vpop.eup %71 }
  0xa8   :  { %v33_v17 = vmul.f32 %v72_v16, %v32_v15 }
  0xaa   :  { %39 = vperm.xlu1 %69, %v33_v17   ;;  %v35_v19 = vmul.f32 %v33_v17, %v25_v8 }
  0xac   :  { %v36_v20 = vsub.f32 %v34_v18, %v35_v19 }
  0xae   :  { %46 = vperm.xlu1 %69, %v36_v20  }
 0x125   :  { %v40_v21 = vpop.permute.xlu1 %39 }
 0x126   :  { %v42_v22 = vmul.f32 %v40_v21, %v15_v0  ;;  %v43_v23 = vmul.f32 %v40_v21, %v16_v1 }
 0x129   :  { %v47_v24 = vpop.permute.xlu1 %46 }
 0x12a   :  { %v49_v25 = vadd.f32 %v47_v24, %v42_v22  ;;  %v50_v26 = vadd.f32 %v47_v24, %v43_v23 }
 0x12c   :  { %51 = vst [vmem:[#allocation2] sm:$0xff] %v49_v25  ;;  %52 = vst [vmem:[#allocation2 + $0x8] sm:$0xff] %v50_v26 }
 0x12d   :  { %84 = shalt.err (!%p81_p4)
}
 0x12e   :  { %62 = dma.vmem_to_hbm [thread:$0]  %s60_s20, 256, %s135_s3, [#allocation3]  }
 0x12f   :  { %93 = dma.done.wait [#allocation3], 256  }
 0x130   :  { %94 = vsyncadd [#allocation3], 4294967040 }
 0x131   :  { %66 = vsyncpa [#allocation3], 1 }

</bundles_post_ra>
